<compile_context>
chip_gen: v7x
topology: tpu7x:2x2x1
jax: 0.10.0
libtpu: 0.0.40
codegen_flags: <defaults>
</compile_context>

<pallas_src>
import functools

import jax
import jax.numpy as jnp
from jax.experimental import pallas as pl
from jax.experimental.pallas import tpu as pltpu

_LANE = 128


def _round_up(x, m):
    return ((x + m - 1) // m) * m


def _tensorcores_per_chip():
    # Only v7x has 2 TensorCores per chip; everything else (and non-TPU / interpret)
    # is treated as 1 so we never split a batch that fits one tile for no benefit.
    try:
        kind = (jax.devices()[0].device_kind or "").lower()
    except Exception:
        return 1
    return 2 if "v7" in kind else 1


def _choose_tile_b(B, requested, align, tensorcores):
    """Sublane-aligned batch tile.  On v7x prefer an even number of >=2 grid steps so
    both TensorCores get balanced work; on v5e/v6e just take the biggest tile."""
    tb = min(requested, _round_up(B, align))
    if tensorcores > 1 and B > align:
        steps = pl.cdiv(B, tb)
        if steps < 2 or steps % 2:
            steps = max(2, steps + (steps % 2))
            tb = max(align, _round_up(pl.cdiv(B, steps), align))
    return tb


def _gate_kernel(num_layers, compute_dtype, *refs):
    # refs = (x_ref, w0, b0, w1, b1, ..., w_gate, b_gate, o_ref)
    x_ref = refs[0]
    o_ref = refs[-1]
    p = refs[1:-1]

    # Cast the f32 x tile to the matmul compute dtype inside VMEM (no wrapper HBM pass).
    h = x_ref[...].astype(compute_dtype)

    # Hidden layers: Linear (MXU, f32 accumulation) + bias / ReLU in f32.
    for l in range(num_layers):
        w = p[2 * l][...]
        b = p[2 * l + 1][...]            # f32
        z = jnp.dot(h, w, preferred_element_type=jnp.float32) + b
        h = jnp.maximum(z, 0.0).astype(compute_dtype)

    # Gate layer: Linear + softmax over the lane-dense (padded to 128) last dim.
    wg = p[2 * num_layers][...]
    bg = p[2 * num_layers + 1][...]      # f32; padded columns are -1e30
    logits = jnp.dot(h, wg, preferred_element_type=jnp.float32) + bg
    m = jnp.max(logits, axis=-1, keepdims=True)
    e = jnp.exp(logits - m)              # padded columns underflow to exactly 0
    denom = jnp.sum(e, axis=-1, keepdims=True)
    o_ref[...] = (e / denom).astype(o_ref.dtype)   # exact normalization


def gate_nn_forward(x, params, *, num_layers, tile_b=512,
                    compute_dtype=jnp.bfloat16, out_dtype=None):
    """params: list of (W, b); W is (in, out) (transposed vs. torch), b is (1, out)."""
    assert len(params) == num_layers + 1
    B, D_in = x.shape
    n_components = params[-1][0].shape[1]
    gate_size = params[0][0].shape[1]

    compute_dtype = jnp.dtype(compute_dtype)
    if out_dtype is None:
        out_dtype = compute_dtype if compute_dtype == jnp.bfloat16 else jnp.float32
    out_dtype = jnp.dtype(out_dtype)

    n_out_pad = _round_up(n_components, _LANE)
    align = 16 if (compute_dtype == jnp.bfloat16 and B >= 16) else 8
    tb = _choose_tile_b(B, tile_b, align, _tensorcores_per_chip())
    grid = (pl.cdiv(B, tb),)

    # x streamed per batch tile, unpadded (784 == full array dim is a legal lane size).
    in_specs = [pl.BlockSpec((tb, D_in), lambda i: (i, 0))]

    # Resident weights/biases.  Only the tiny gate layer is padded to a lane-dense
    # 128-wide slab (zero weight cols, -1e30 bias -> padded softmax lanes exactly 0).
    w_itemsize = compute_dtype.itemsize
    weight_bytes = sum(w.size * w_itemsize + b.size * 4 for (w, b) in params)
    single_buffer_weights = weight_bytes > (8 << 20)   # only matters for big gate_size
    w_kwargs = {"pipeline_mode": pl.Buffered(1)} if single_buffer_weights else {}

    flat = []
    n_params = len(params)
    for li, (w, b) in enumerate(params):
        w_p, b_p = w, b
        if li == n_params - 1 and n_out_pad != n_components:
            w_p = jnp.pad(w_p, ((0, 0), (0, n_out_pad - n_components)))
            b_p = jnp.pad(b_p, ((0, 0), (0, n_out_pad - n_components)),
                          constant_values=-1e30)
        flat.append(w_p.astype(compute_dtype))     # matmul inputs in compute dtype
        flat.append(b_p.astype(jnp.float32))       # bias (incl. -1e30 pad) MUST stay f32
        in_specs.append(pl.BlockSpec(flat[-2].shape, lambda i: (0, 0), **w_kwargs))
        in_specs.append(pl.BlockSpec(flat[-1].shape, lambda i: (0, 0), **w_kwargs))

    out_spec = pl.BlockSpec((tb, n_out_pad), lambda i: (i, 0))   # lane-dense store

    # Only raise the scoped VMEM limit when the default could be tight (large gate_size).
    vmem_est = (2 * tb * D_in * x.dtype.itemsize
                + 2 * tb * n_out_pad * out_dtype.itemsize
                + (1 if single_buffer_weights else 2) * weight_bytes)
    ckw = {"dimension_semantics": ("parallel",)}
    if vmem_est > (16 << 20):
        ckw["vmem_limit_bytes"] = int(min(vmem_est + (8 << 20), 120 << 20))

    flops = 2 * B * (D_in * gate_size
                     + gate_size * gate_size * max(num_layers - 1, 0)
                     + gate_size * n_out_pad)
    bytes_accessed = int(x.size * x.dtype.itemsize + weight_bytes
                         + B * n_out_pad * out_dtype.itemsize)

    kernel = functools.partial(_gate_kernel, num_layers, compute_dtype)
    out = pl.pallas_call(
        kernel,
        out_shape=jax.ShapeDtypeStruct((B, n_out_pad), out_dtype),
        grid_spec=pltpu.PrefetchScalarGridSpec(
            num_scalar_prefetch=0,
            grid=grid,
            in_specs=in_specs,
            out_specs=out_spec,
        ),
        compiler_params=pltpu.CompilerParams(**ckw),
        cost_estimate=pl.CostEstimate(
            flops=int(flops),
            transcendentals=int(B * n_out_pad),
            bytes_accessed=bytes_accessed,
        ),
    )(x, *flat)
    # Slice the real gate columns and return f32 probabilities (matches torch module).
    return out[:, :n_components].astype(jnp.float32)


def init_gate_nn_params(key, n_components, num_layers, gate_size, init_bias_gate=None):
    """Deterministic init matching GateNN.__init__ shapes. Weights stored as (in, out)."""
    dims = [(784, gate_size)] + [(gate_size, gate_size)] * (num_layers - 1)
    dims.append((gate_size, n_components))
    params = []
    for (fan_in, fan_out) in dims:
        key, kw, kb = jax.random.split(key, 3)
        bound = 1.0 / jnp.sqrt(fan_in)
        w = jax.random.uniform(kw, (fan_in, fan_out), jnp.float32, -bound, bound)
        b = jax.random.uniform(kb, (1, fan_out), jnp.float32, -bound, bound)
        params.append((w, b))
    if init_bias_gate is not None:
        w_g, _ = params[-1]
        params[-1] = (w_g, jnp.asarray(init_bias_gate, jnp.float32).reshape(1, -1))
    return params


def gate_nn_reference(x, params):
    h = x
    for (w, b) in params[:-1]:
        h = jnp.maximum(h @ w + b, 0.0)
    w_g, b_g = params[-1]
    return jax.nn.softmax(h @ w_g + b_g, axis=-1)


if __name__ == "__main__":
    key = jax.random.PRNGKey(0)
    n_components = 4
    num_layers = 2
    gate_size = 128
    batch = 8

    k_params, k_x, k_x2 = jax.random.split(key, 3)
    init_bias_gate = [0.0] * n_components
    params = init_gate_nn_params(k_params, n_components, num_layers, gate_size,
                                 init_bias_gate=init_bias_gate)
    x = jax.random.normal(k_x, (batch, 784), jnp.float32)
    ref = gate_nn_reference(x, params)

    # f32 matmul path: tight check (softmax normalization is now exact).
    out_f32 = jax.block_until_ready(
        gate_nn_forward(x, params, num_layers=num_layers, compute_dtype=jnp.float32)
    )
    assert out_f32.shape == (batch, n_components)
    assert jnp.allclose(out_f32, ref, atol=2e-3, rtol=2e-3)
    assert jnp.allclose(jnp.sum(out_f32, axis=-1), 1.0, atol=1e-3)

    # Default bf16 matmul + bf16 store path (fast path on v6e/v7x); the bf16 store
    # rounding limits row-sum accuracy to a few 1e-3, hence the looser tolerance.
    out_bf16 = jax.block_until_ready(gate_nn_forward(x, params, num_layers=num_layers))
    assert out_bf16.shape == (batch, n_components)
    assert jnp.allclose(out_bf16, ref, atol=5e-2, rtol=5e-2)
    assert jnp.allclose(jnp.sum(out_bf16, axis=-1), 1.0, atol=1e-2)

    # Ragged batch: exercises OOB-read / OOB-write-discard tail handling (no jnp.pad).
    batch2 = 300
    x2 = jax.random.normal(k_x2, (batch2, 784), jnp.float32)
    ref2 = gate_nn_reference(x2, params)
    out2 = jax.block_until_ready(gate_nn_forward(x2, params, num_layers=num_layers))
    assert out2.shape == (batch2, n_components)
    assert jnp.allclose(out2, ref2, atol=5e-2, rtol=5e-2)
    assert jnp.allclose(jnp.sum(out2, axis=-1), 1.0, atol=1e-2)

    print("KERNEL_OK")
</pallas_src>

<mosaic_0001>
module attributes {stable_mosaic.version = 11 : i64} {
  func.func @_gate_kernel(%arg0: i32, %arg1: memref<8x784xf32, #tpu.memory_space<vmem>>, %arg2: memref<784x128xf32, #tpu.memory_space<vmem>>, %arg3: memref<1x128xf32, #tpu.memory_space<vmem>>, %arg4: memref<128x128xf32, #tpu.memory_space<vmem>>, %arg5: memref<1x128xf32, #tpu.memory_space<vmem>>, %arg6: memref<128x128xf32, #tpu.memory_space<vmem>>, %arg7: memref<1x128xf32, #tpu.memory_space<vmem>>, %arg8: memref<8x128xf32, #tpu.memory_space<vmem>>) attributes {dimension_semantics = [#tpu.dimension_semantics<parallel>], iteration_bounds = array<i64: 1>, scalar_prefetch = 0 : i64, scratch_operands = 0 : i64, tpu.core_type = #tpu.core_type<tc>, window_params = [{transform_indices = @transform_0, window_bounds = array<i64: 8, 784>}, {pipeline_mode = #tpu.pipeline_mode<synchronous>, transform_indices = @transform_1, window_bounds = array<i64: 784, 128>}, {pipeline_mode = #tpu.pipeline_mode<synchronous>, transform_indices = @transform_2, window_bounds = array<i64: 1, 128>}, {pipeline_mode = #tpu.pipeline_mode<synchronous>, transform_indices = @transform_3, window_bounds = array<i64: 128, 128>}, {pipeline_mode = #tpu.pipeline_mode<synchronous>, transform_indices = @transform_4, window_bounds = array<i64: 1, 128>}, {pipeline_mode = #tpu.pipeline_mode<synchronous>, transform_indices = @transform_5, window_bounds = array<i64: 128, 128>}, {pipeline_mode = #tpu.pipeline_mode<synchronous>, transform_indices = @transform_6, window_bounds = array<i64: 1, 128>}, {transform_indices = @transform_7, window_bounds = array<i64: 8, 128>}]} {
    %c0 = arith.constant 0 : index
    %c0_0 = arith.constant 0 : index
    %0 = vector.load %arg1[%c0, %c0_0] : memref<8x784xf32, #tpu.memory_space<vmem>>, vector<8x784xf32>
    %c0_1 = arith.constant 0 : index
    %c0_2 = arith.constant 0 : index
    %1 = vector.load %arg2[%c0_1, %c0_2] : memref<784x128xf32, #tpu.memory_space<vmem>>, vector<784x128xf32>
    %c0_3 = arith.constant 0 : index
    %c0_4 = arith.constant 0 : index
    %2 = vector.load %arg3[%c0_3, %c0_4] : memref<1x128xf32, #tpu.memory_space<vmem>>, vector<1x128xf32>
    %cst = arith.constant dense<0.000000e+00> : vector<8x128xf32>
    %3 = tpu.matmul %0, %1, %cst {dimension_numbers = #tpu.dot_dimension_numbers<[1], [0], [0], [1], [0, 0, 1, 1], [], []>} : vector<8x784xf32>, vector<784x128xf32>, vector<8x128xf32> -> vector<8x128xf32>
    %4 = vector.broadcast %2 : vector<1x128xf32> to vector<8x128xf32>
    %5 = arith.addf %3, %4 : vector<8x128xf32>
    %cst_5 = arith.constant 0.000000e+00 : f32
    %6 = vector.broadcast %cst_5 : f32 to vector<8x128xf32>
    %7 = arith.maximumf %5, %6 : vector<8x128xf32>
    %c0_6 = arith.constant 0 : index
    %c0_7 = arith.constant 0 : index
    %8 = vector.load %arg4[%c0_6, %c0_7] : memref<128x128xf32, #tpu.memory_space<vmem>>, vector<128x128xf32>
    %c0_8 = arith.constant 0 : index
    %c0_9 = arith.constant 0 : index
    %9 = vector.load %arg5[%c0_8, %c0_9] : memref<1x128xf32, #tpu.memory_space<vmem>>, vector<1x128xf32>
    %cst_10 = arith.constant dense<0.000000e+00> : vector<8x128xf32>
    %10 = tpu.matmul %7, %8, %cst_10 {dimension_numbers = #tpu.dot_dimension_numbers<[1], [0], [0], [1], [0, 0, 1, 1], [], []>} : vector<8x128xf32>, vector<128x128xf32>, vector<8x128xf32> -> vector<8x128xf32>
    %11 = vector.broadcast %9 : vector<1x128xf32> to vector<8x128xf32>
    %12 = arith.addf %10, %11 : vector<8x128xf32>
    %cst_11 = arith.constant 0.000000e+00 : f32
    %13 = vector.broadcast %cst_11 : f32 to vector<8x128xf32>
    %14 = arith.maximumf %12, %13 : vector<8x128xf32>
    %c0_12 = arith.constant 0 : index
    %c0_13 = arith.constant 0 : index
    %15 = vector.load %arg6[%c0_12, %c0_13] : memref<128x128xf32, #tpu.memory_space<vmem>>, vector<128x128xf32>
    %c0_14 = arith.constant 0 : index
    %c0_15 = arith.constant 0 : index
    %16 = vector.load %arg7[%c0_14, %c0_15] : memref<1x128xf32, #tpu.memory_space<vmem>>, vector<1x128xf32>
    %cst_16 = arith.constant dense<0.000000e+00> : vector<8x128xf32>
    %17 = tpu.matmul %14, %15, %cst_16 {dimension_numbers = #tpu.dot_dimension_numbers<[1], [0], [0], [1], [0, 0, 1, 1], [], []>} : vector<8x128xf32>, vector<128x128xf32>, vector<8x128xf32> -> vector<8x128xf32>
    %18 = vector.broadcast %16 : vector<1x128xf32> to vector<8x128xf32>
    %19 = arith.addf %17, %18 : vector<8x128xf32>
    %cst_17 = arith.constant dense<0xFF800000> : vector<8xf32>
    %20 = vector.multi_reduction <maximumf>, %19, %cst_17 [1] : vector<8x128xf32> to vector<8xf32>
    %21 = vector.shape_cast %20 : vector<8xf32> to vector<8x1xf32>
    %22 = vector.broadcast %21 : vector<8x1xf32> to vector<8x128xf32>
    %23 = arith.subf %19, %22 : vector<8x128xf32>
    %24 = math.exp %23 : vector<8x128xf32>
    %cst_18 = arith.constant dense<0.000000e+00> : vector<8xf32>
    %25 = vector.multi_reduction <add>, %24, %cst_18 [1] : vector<8x128xf32> to vector<8xf32>
    %26 = vector.shape_cast %25 : vector<8xf32> to vector<8x1xf32>
    %27 = vector.broadcast %26 : vector<8x1xf32> to vector<8x128xf32>
    %28 = arith.divf %24, %27 : vector<8x128xf32>
    %c0_19 = arith.constant 0 : index
    %c0_20 = arith.constant 0 : index
    %29 = vector.load %arg8[%c0_19, %c0_20] : memref<8x128xf32, #tpu.memory_space<vmem>>, vector<8x128xf32>
    tpu.vector_store %arg8[%c0_19, %c0_20], %28 {strides = array<i32>} : memref<8x128xf32, #tpu.memory_space<vmem>>, vector<8x128xf32>,
    return
  }
  func.func @transform_0(%arg0: i32) -> (i32, i32) {
    %c0_i32 = arith.constant 0 : i32
    %c0_i32_0 = arith.constant 0 : i32
    return %arg0, %c0_i32 : i32, i32
  }
  func.func @transform_1(%arg0: i32) -> (i32, i32) {
    %c0_i32 = arith.constant 0 : i32
    %c0_i32_0 = arith.constant 0 : i32
    %c0_i32_1 = arith.constant 0 : i32
    return %c0_i32, %c0_i32_0 : i32, i32
  }
  func.func @transform_2(%arg0: i32) -> (i32, i32) {
    %c0_i32 = arith.constant 0 : i32
    %c0_i32_0 = arith.constant 0 : i32
    %c0_i32_1 = arith.constant 0 : i32
    return %c0_i32, %c0_i32_0 : i32, i32
  }
  func.func @transform_3(%arg0: i32) -> (i32, i32) {
    %c0_i32 = arith.constant 0 : i32
    %c0_i32_0 = arith.constant 0 : i32
    %c0_i32_1 = arith.constant 0 : i32
    return %c0_i32, %c0_i32_0 : i32, i32
  }
  func.func @transform_4(%arg0: i32) -> (i32, i32) {
    %c0_i32 = arith.constant 0 : i32
    %c0_i32_0 = arith.constant 0 : i32
    %c0_i32_1 = arith.constant 0 : i32
    return %c0_i32, %c0_i32_0 : i32, i32
  }
  func.func @transform_5(%arg0: i32) -> (i32, i32) {
    %c0_i32 = arith.constant 0 : i32
    %c0_i32_0 = arith.constant 0 : i32
    %c0_i32_1 = arith.constant 0 : i32
    return %c0_i32, %c0_i32_0 : i32, i32
  }
  func.func @transform_6(%arg0: i32) -> (i32, i32) {
    %c0_i32 = arith.constant 0 : i32
    %c0_i32_0 = arith.constant 0 : i32
    %c0_i32_1 = arith.constant 0 : i32
    return %c0_i32, %c0_i32_0 : i32, i32
  }
  func.func @transform_7(%arg0: i32) -> (i32, i32) {
    %c0_i32 = arith.constant 0 : i32
    %c0_i32_0 = arith.constant 0 : i32
    return %arg0, %c0_i32 : i32, i32
  }
}

</mosaic_0001>

<bundles_post_ra>
// kernel: tpu_custom_call.1
= control target key start
LH: loop header
LB: loop body
LE: loop exit
PB: predicated region body
PF: predicated region fallthrough
CT: control target
= control target key end

     0   :  { %12 = vsyncpa [#allocation3], 0  ;;  %s1341_s0 = inlined_call_operand.hbm [shape: f32[8,784], index: 0, kind: input, shape index: {}]   ;;  %s1342_s1 = inlined_call_operand.hbm [shape: f32[784,128], index: 1, kind: input, shape index: {}]   ;;  %s1343_s2 = inlined_call_operand.vmem [shape: f32[1,128], index: 2, kind: input, shape index: {}]   ;;  %s1344_s3 = inlined_call_operand.hbm [shape: f32[128,128], index: 3, kind: input, shape index: {}]   ;;  %s1345_s4 = inlined_call_operand.vmem [shape: f32[1,128], index: 4, kind: input, shape index: {}]   ;;  %s1346_s5 = inlined_call_operand.hbm [shape: f32[128,128], index: 5, kind: input, shape index: {}]   ;;  %s1347_s6 = inlined_call_operand.vmem [shape: f32[1,128], index: 6, kind: input, shape index: {}]   ;;  %s1348_s7 = inlined_call_operand.hbm [shape: f32[8,128], index: 7, kind: output, shape index: {}]  }
   0x1   :  { %13 = vsyncpa [#allocation6], 0 }
   0x2   :  { %14 = vsyncpa [#allocation9], 0 }
   0x3   :  { %15 = vsyncpa [#allocation4], 0  ;;  %s1193_s24 = smov [#allocation5]   ;;  %s1075_s28 = scalar_lea.hbm %s1342_s1, 12544 }
   0x4   :  { %s31_s25 = sshll.u32 %s1193_s24, 4  ;;  %p1076_p0 = scmp.ne.s32.totalorder %s1342_s1, %s1075_s28  ;;  %s32_s25 = int_to_ptr.vmem [resolvable:$true] %s31_s25 }
   0x5   :  { %p1079_p1 = scmp.lt.u32.totalorder %s1075_s28, %s1342_s1 }
   0x7   :  { %p1081_p2 = pnand %p1079_p1, %p1076_p0 }
   0x9   :  { %1084 = shalt.err (!%p1081_p2)
}
   0xa   :  { %s1085_s10 = scalar_lea.vmem %s32_s25, 12544  ;;  %p1090_p4 = scmp.lt.s32.totalorder %s32_s25, %s32_s25 }
   0xb   :  { %p1086_p3 = scmp.ne.s32.totalorder %s32_s25, %s1085_s10  ;;  %p1091_p5 = scmp.lt.s32.totalorder %s1085_s10, %s1085_s10 }
   0xd   :  { %p1092_p6 = por %p1091_p5, %p1090_p4 }
   0xf   :  { %p1093_p7 = pnand %p1092_p6, %p1086_p3 }
  0x11   :  { %1096 = shalt.err (!%p1093_p7)
}
  0x12   :  { %s1194_s11 = smov 128   ;;  %s1195_s12 = smov 8  }
  0x13   :  { %37 = dma.hbm_to_vmem [thread:$0]  %s1342_s1, 12544, %s32_s25, [#allocation6], %s1194_s11, %s1194_s11, %s1195_s12  }
  0x14   :  { %s1196_s15 = smov [#allocation2]   ;;  %s1197_s17 = smov [#allocation7]  }
  0x15   :  { %s22_s16 = sshll.u32 %s1196_s15, 4  ;;  %s45_s18 = sshll.u32 %s1197_s17, 4  ;;  %s23_s16 = int_to_ptr.vmem [resolvable:$true] %s22_s16  ;;  %s46_s18 = int_to_ptr.vmem [resolvable:$true] %s45_s18 }
  0x16   :  { %s1097_s21 = scalar_lea.hbm %s1341_s0, 896 }
  0x17   :  { %p1098_p8 = scmp.ne.s32.totalorder %s1341_s0, %s1097_s21  ;;  %p1101_p9 = scmp.lt.u32.totalorder %s1097_s21, %s1341_s0 }
  0x19   :  { %p1103_p10 = pnand %p1101_p9, %p1098_p8 }
  0x1b   :  { %1106 = shalt.err (!%p1103_p10)
}
  0x1c   :  { %s1107_s1 = scalar_lea.vmem %s23_s16, 896  ;;  %p1112_p12 = scmp.lt.s32.totalorder %s23_s16, %s23_s16 }
  0x1d   :  { %p1108_p11 = scmp.ne.s32.totalorder %s23_s16, %s1107_s1  ;;  %p1113_p13 = scmp.lt.s32.totalorder %s1107_s1, %s1107_s1 }
  0x1f   :  { %p1114_p0 = por %p1113_p13, %p1112_p12 }
  0x21   :  { %p1115_p1 = pnand %p1114_p0, %p1108_p11 }
  0x23   :  { %1118 = shalt.err (!%p1115_p1)
}
  0x24   :  { %25 = dma.hbm_to_vmem [thread:$0]  %s1341_s0, 896, %s23_s16, [#allocation3]  }
  0x25   :  { %s1119_s30 = scalar_lea.hbm %s1344_s3, 2048 }
  0x26   :  { %p1120_p2 = scmp.ne.s32.totalorder %s1344_s3, %s1119_s30  ;;  %p1123_p3 = scmp.lt.u32.totalorder %s1119_s30, %s1344_s3 }
  0x28   :  { %p1125_p4 = pnand %p1123_p3, %p1120_p2 }
  0x2a   :  { %1128 = shalt.err (!%p1125_p4)
}
  0x2b   :  { %s1129_s14 = scalar_lea.vmem %s46_s18, 2048  ;;  %p1134_p6 = scmp.lt.s32.totalorder %s46_s18, %s46_s18 }
  0x2c   :  { %p1130_p5 = scmp.ne.s32.totalorder %s46_s18, %s1129_s14  ;;  %p1135_p7 = scmp.lt.s32.totalorder %s1129_s14, %s1129_s14 }
  0x2e   :  { %p1136_p8 = por %p1135_p7, %p1134_p6 }
  0x30   :  { %p1137_p9 = pnand %p1136_p8, %p1130_p5 }
  0x32   :  { %1140 = shalt.err (!%p1137_p9)
}
  0x33   :  { %51 = dma.hbm_to_vmem [thread:$0]  %s1344_s3, 2048, %s46_s18, [#allocation6], %s1194_s11, %s1194_s11, %s1195_s12  }
  0x34   :  { %s1198_s16 = smov [#allocation8]   ;;  %s1141_s21 = scalar_lea.hbm %s1346_s5, 2048 }
  0x35   :  { %s59_s17 = sshll.u32 %s1198_s16, 4  ;;  %p1142_p10 = scmp.ne.s32.totalorder %s1346_s5, %s1141_s21  ;;  %s60_s17 = int_to_ptr.vmem [resolvable:$true] %s59_s17 }
  0x36   :  { %p1145_p11 = scmp.lt.u32.totalorder %s1141_s21, %s1346_s5 }
  0x38   :  { %p1147_p12 = pnand %p1145_p11, %p1142_p10 }
  0x3a   :  { %1150 = shalt.err (!%p1147_p12)
}
  0x3b   :  { %s1151_s1 = scalar_lea.vmem %s60_s17, 2048  ;;  %p1156_p0 = scmp.lt.s32.totalorder %s60_s17, %s60_s17 }
  0x3c   :  { %p1152_p13 = scmp.ne.s32.totalorder %s60_s17, %s1151_s1  ;;  %p1157_p1 = scmp.lt.s32.totalorder %s1151_s1, %s1151_s1 }
  0x3e   :  { %p1158_p2 = por %p1157_p1, %p1156_p0 }
  0x40   :  { %p1159_p3 = pnand %p1158_p2, %p1152_p13 }
  0x42   :  { %1162 = shalt.err (!%p1159_p3)
}
  0x43   :  { %65 = dma.hbm_to_vmem [thread:$0]  %s1346_s5, 2048, %s60_s17, [#allocation9], %s1194_s11, %s1194_s11, %s1195_s12  }
  0x44   :  { %1185 = dma.done.wait [#allocation3], 896  }
  0x45   :  { %1186 = vsyncadd [#allocation3], 4294966400 }
  0x46   :  { %1187 = dma.done.wait [#allocation6], 14592  }
  0x47   :  { %1188 = vsyncadd [#allocation6], 4294952704 }
  0x48   :  { %1189 = dma.done.wait [#allocation9], 2048  }
  0x49   :  { %1190 = vsyncadd [#allocation9], 4294965248  ;;  %v103_v0 = vld [vmem:[#allocation5 + $0x80] sm:$0xff]  ;;  %v104_v1 = vld [vmem:[#allocation5 + $0x88] sm:$0xff]  ;;  %vm1200_vm0 = vmmov 0   ;;  %vm192_vm1 = vcmask 130048  }
  0x4a   :  { %v87_v2 = vld [vmem:[#allocation5] sm:$0xff]  ;;  %v914_v3 = vpack.c.bf16 %v104_v1, %v103_v0  ;;  %v88_v4 = vld [vmem:[#allocation5 + $0x8] sm:$0xff]  ;;  %v105_v11 = vld [vmem:[#allocation5 + $0x90] sm:$0xff] }
  0x4b   :  { %v135_v5 = vld [vmem:[#allocation5 + $0x180] sm:$0xff]  ;;  %v136_v6 = vld [vmem:[#allocation5 + $0x188] sm:$0xff]  ;;  %v916_v7 = vpack.c.bf16 %v88_v4, %v87_v2  ;;  %v106_v13 = vld [vmem:[#allocation5 + $0x98] sm:$0xff] }
  0x4c   :  { %v946_v8 = vpack.c.bf16 %v136_v6, %v135_v5  ;;  %v119_v9 = vld [vmem:[#allocation5 + $0x100] sm:$0xff]  ;;  %v120_v10 = vld [vmem:[#allocation5 + $0x108] sm:$0xff]  ;;  %915 = vmatprep.subr.bf16.mxu0 %v914_v3  ;;  %v89_v14 = vld [vmem:[#allocation5 + $0x10] sm:$0xff]  ;;  %v918_v16 = vpack.c.bf16 %v106_v13, %v105_v11 }
  0x4d   :  { %v948_v12 = vpack.c.bf16 %v120_v10, %v119_v9  ;;  %v90_v15 = vld [vmem:[#allocation5 + $0x18] sm:$0xff]  ;;  %917 = vmatpush3.bf16.msra.mxu0 %v916_v7  ;;  %v137_v18 = vld [vmem:[#allocation5 + $0x190] sm:$0xff]  ;;  %v107_v23 = vld [vmem:[#allocation5 + $0xa0] sm:$0xff] }
  0x4e   :  { %947 = vmatprep.subr.bf16.mxu1 %v946_v8  ;;  %v920_v17 = vpack.c.bf16 %v90_v15, %v89_v14  ;;  %v138_v19 = vld [vmem:[#allocation5 + $0x198] sm:$0xff]  ;;  %v121_v20 = vld [vmem:[#allocation5 + $0x110] sm:$0xff]  ;;  %v108_v24 = vld [vmem:[#allocation5 + $0xa8] sm:$0xff]  ;;  %919 = vmatprep.subr.bf16.mxu0 %v918_v16 }
  0x4f   :  { %949 = vmatpush3.bf16.msra.mxu1 %v948_v12  ;;  %v950_v21 = vpack.c.bf16 %v138_v19, %v137_v18  ;;  %v122_v22 = vld [vmem:[#allocation5 + $0x118] sm:$0xff]  ;;  %v922_v26 = vpack.c.bf16 %v108_v24, %v107_v23  ;;  %v91_v27 = vld [vmem:[#allocation5 + $0x20] sm:$0xff]  ;;  %v92_v28 = vld [vmem:[#allocation5 + $0x28] sm:$0xff] }
  0x50   :  { %v952_v25 = vpack.c.bf16 %v122_v22, %v121_v20  ;;  %v139_v29 = vld [vmem:[#allocation5 + $0x1a0] sm:$0xff]  ;;  %v140_v30 = vld [vmem:[#allocation5 + $0x1a8] sm:$0xff]  ;;  %v924_v33 = vpack.c.bf16 %v92_v28, %v91_v27  ;;  %v109_v35 = vld [vmem:[#allocation5 + $0xb0] sm:$0xff] }
  0x51   :  { %951 = vmatprep.subr.bf16.mxu1 %v950_v21  ;;  %v123_v31 = vld [vmem:[#allocation5 + $0x120] sm:$0xff]  ;;  %v124_v32 = vld [vmem:[#allocation5 + $0x128] sm:$0xff]  ;;  %921 = vmatpush3.bf16.msra.mxu0 %v920_v17  ;;  %v954_v34 = vpack.c.bf16 %v140_v30, %v139_v29  ;;  %v110_v36 = vld [vmem:[#allocation5 + $0xb8] sm:$0xff] }
  0x52   :  { %v93_v37 = vld [vmem:[#allocation5 + $0x30] sm:$0xff]  ;;  %923 = vmatprep.subr.bf16.mxu0 %v922_v26  ;;  %v956_v38 = vpack.c.bf16 %v124_v32, %v123_v31  ;;  %v926_v39 = vpack.c.bf16 %v110_v36, %v109_v35  ;;  %v94_v40 = vld [vmem:[#allocation5 + $0x38] sm:$0xff]  ;;  %v111_v46 = vld [vmem:[#allocation5 + $0xc0] sm:$0xff] }
  0x53   :  { %953 = vmatpush3.bf16.msra.mxu1 %v952_v25  ;;  %v141_v41 = vld [vmem:[#allocation5 + $0x1b0] sm:$0xff]  ;;  %v142_v42 = vld [vmem:[#allocation5 + $0x1b8] sm:$0xff]  ;;  %v112_v47 = vld [vmem:[#allocation5 + $0xc8] sm:$0xff]  ;;  %v928_v48 = vpack.c.bf16 %v94_v40, %v93_v37 }
  0x54   :  { %955 = vmatprep.subr.bf16.mxu1 %v954_v34  ;;  %v958_v43 = vpack.c.bf16 %v142_v42, %v141_v41  ;;  %v125_v44 = vld [vmem:[#allocation5 + $0x130] sm:$0xff]  ;;  %v126_v45 = vld [vmem:[#allocation5 + $0x138] sm:$0xff]  ;;  %v143_v49 = vld [vmem:[#allocation5 + $0x1c0] sm:$0xff]  ;;  %v930_v52 = vpack.c.bf16 %v112_v47, %v111_v46 }
  0x55   :  { %925 = vmatpush3.bf16.msra.mxu0 %v924_v33  ;;  %v144_v50 = vld [vmem:[#allocation5 + $0x1c8] sm:$0xff]  ;;  %v960_v51 = vpack.c.bf16 %v126_v45, %v125_v44  ;;  %v95_v53 = vld [vmem:[#allocation5 + $0x40] sm:$0xff]  ;;  %v113_v58 = vld [vmem:[#allocation5 + $0xd0] sm:$0xff] }
  0x56   :  { %927 = vmatprep.subr.bf16.mxu0 %v926_v39  ;;  %v96_v54 = vld [vmem:[#allocation5 + $0x48] sm:$0xff]  ;;  %v127_v55 = vld [vmem:[#allocation5 + $0x140] sm:$0xff]  ;;  %v962_v56 = vpack.c.bf16 %v144_v50, %v143_v49  ;;  %v114_v59 = vld [vmem:[#allocation5 + $0xd8] sm:$0xff]  ;;  %v1199_v50 = vmov 0.0|0.0  }
  0x57   :  { %957 = vmatpush3.bf16.msra.mxu1 %v956_v38  ;;  %v128_v57 = vld [vmem:[#allocation5 + $0x148] sm:$0xff]  ;;  %v145_v60 = vld [vmem:[#allocation5 + $0x1d0] sm:$0xff]  ;;  %v146_v61 = vld [vmem:[#allocation5 + $0x1d8] sm:$0xff]  ;;  %v932_v62 = vpack.c.bf16 %v96_v54, %v95_v53  ;;  %v934_v0 = vpack.c.bf16 %v114_v59, %v113_v58 }
  0x58   :  { %959 = vmatprep.subr.bf16.mxu1 %v958_v43  ;;  %v964_v63 = vpack.c.bf16 %v128_v57, %v127_v55  ;;  %v97_v1 = vld [vmem:[#allocation5 + $0x50] sm:$0xff]  ;;  %v98_v2 = vld [vmem:[#allocation5 + $0x58] sm:$0xff]  ;;  %v966_v4 = vpack.c.bf16 %v146_v61, %v145_v60  ;;  %v115_v6 = vld [vmem:[#allocation5 + $0xe0] sm:$0xff]  ;;  %v1201_v60 = vmov 0.0  }
  0x59   :  { %929 = vmatpush3.bf16.msra.mxu0 %v928_v48  ;;  %v129_v3 = vld [vmem:[#allocation5 + $0x150] sm:$0xff]  ;;  %v130_v5 = vld [vmem:[#allocation5 + $0x158] sm:$0xff]  ;;  %v116_v7 = vld [vmem:[#allocation5 + $0xe8] sm:$0xff]  ;;  %v936_v10 = vpack.c.bf16 %v98_v2, %v97_v1 }
  0x5a   :  { %931 = vmatprep.subr.bf16.mxu0 %v930_v52  ;;  %v147_v8 = vld [vmem:[#allocation5 + $0x1e0] sm:$0xff]  ;;  %v148_v9 = vld [vmem:[#allocation5 + $0x1e8] sm:$0xff]  ;;  %v81_v12 = vld [vmem:[#allocation2 + $0x8] sm:$0xff]  ;;  %v968_v13 = vpack.c.bf16 %v130_v5, %v129_v3  ;;  %v938_v14 = vpack.c.bf16 %v116_v7, %v115_v6 }
  0x5b   :  { %961 = vmatpush3.bf16.msra.mxu1 %v960_v51  ;;  %v99_v11 = vld [vmem:[#allocation5 + $0x60] sm:$0xff]  ;;  %v100_v15 = vld [vmem:[#allocation5 + $0x68] sm:$0xff]  ;;  %v970_v18 = vpack.c.bf16 %v148_v9, %v147_v8  ;;  %v117_v19 = vld [vmem:[#allocation5 + $0xf0] sm:$0xff]  ;;  %260 = vmatprep.mubr.f32.mxu0 %v81_v12 }
  0x5c   :  { %963 = vmatprep.subr.bf16.mxu1 %v962_v56  ;;  %v131_v16 = vld [vmem:[#allocation5 + $0x160] sm:$0xff]  ;;  %v132_v17 = vld [vmem:[#allocation5 + $0x168] sm:$0xff]  ;;  %v118_v20 = vld [vmem:[#allocation5 + $0xf8] sm:$0xff]  ;;  %v940_v24 = vpack.c.bf16 %v100_v15, %v99_v11 }
  0x5d   :  { %933 = vmatpush3.bf16.msra.mxu0 %v932_v62  ;;  %v83_v21 = vld [vmem:[#allocation2 + $0x18] sm:$0xff]  ;;  %v149_v22 = vld [vmem:[#allocation5 + $0x1f0] sm:$0xff]  ;;  %v150_v23 = vld [vmem:[#allocation5 + $0x1f8] sm:$0xff]  ;;  %v972_v25 = vpack.c.bf16 %v132_v17, %v131_v16  ;;  %v942_v26 = vpack.c.bf16 %v118_v20, %v117_v19 }
  0x5e   :  { %935 = vmatprep.subr.bf16.mxu0 %v934_v0  ;;  %330 = vmatprep.mubr.f32.mxu1 %v83_v21  ;;  %v101_v27 = vld [vmem:[#allocation5 + $0x70] sm:$0xff]  ;;  %v102_v28 = vld [vmem:[#allocation5 + $0x78] sm:$0xff]  ;;  %v974_v30 = vpack.c.bf16 %v150_v23, %v149_v22  ;;  %v167_v32 = vld [vmem:[#allocation5 + $0x280] sm:$0xff] }
  0x5f   :  { %965 = vmatpush3.bf16.msra.mxu1 %v964_v63  ;;  %v133_v29 = vld [vmem:[#allocation5 + $0x170] sm:$0xff]  ;;  %v134_v31 = vld [vmem:[#allocation5 + $0x178] sm:$0xff]  ;;  %v168_v33 = vld [vmem:[#allocation5 + $0x288] sm:$0xff]  ;;  %v944_v34 = vpack.c.bf16 %v102_v28, %v101_v27 }
  0x60   :  { %967 = vmatprep.subr.bf16.mxu1 %v966_v4  ;;  %v976_v35 = vpack.c.bf16 %v134_v31, %v133_v29  ;;  %v978_v36 = vpack.c.bf16 %v168_v33, %v167_v32  ;;  %v151_v37 = vld [vmem:[#allocation5 + $0x200] sm:$0xff]  ;;  %v152_v38 = vld [vmem:[#allocation5 + $0x208] sm:$0xff]  ;;  %v169_v39 = vld [vmem:[#allocation5 + $0x290] sm:$0xff] }
  0x61   :  { %937 = vmatpush3.bf16.msra.mxu0 %v936_v10  ;;  %v170_v40 = vld [vmem:[#allocation5 + $0x298] sm:$0xff]  ;;  %v80_v41 = vld [vmem:[#allocation2] sm:$0xff]  ;;  %v980_v42 = vpack.c.bf16 %v152_v38, %v151_v37  ;;  %v153_v44 = vld [vmem:[#allocation5 + $0x210] sm:$0xff] }
  0x62   :  { %939 = vmatprep.subr.bf16.mxu0 %v938_v14  ;;  %v82_v43 = vld [vmem:[#allocation2 + $0x10] sm:$0xff]  ;;  %v982_v45 = vpack.c.bf16 %v170_v40, %v169_v39  ;;  %v171_v47 = vld [vmem:[#allocation5 + $0x2a0] sm:$0xff]  ;;  %v172_v48 = vld [vmem:[#allocation5 + $0x2a8] sm:$0xff] }
  0x63   :  { %969 = vmatpush3.bf16.msra.mxu1 %v968_v13  ;;  %v154_v46 = vld [vmem:[#allocation5 + $0x218] sm:$0xff]  ;;  %v85_v49 = vld [vmem:[#allocation2 + $0x28] sm:$0xff]  ;;  %v183_v51 = vld [vmem:[#allocation5 + $0x300] sm:$0xff]  ;;  %v986_v55 = vpack.c.bf16 %v172_v48, %v171_v47 }
  0x64   :  { %971 = vmatprep.subr.bf16.mxu1 %v970_v18  ;;  %v184_v52 = vld [vmem:[#allocation5 + $0x308] sm:$0xff]  ;;  %v984_v54 = vpack.c.bf16 %v154_v46, %v153_v44  ;;  %v155_v56 = vld [vmem:[#allocation5 + $0x220] sm:$0xff]  ;;  %v173_v58 = vld [vmem:[#allocation5 + $0x2b0] sm:$0xff] }
  0x65   :  { %941 = vmatpush3.bf16.msra.mxu0 %v940_v24  ;;  %v1011_v53 = vpack.c.bf16 %v184_v52, %v183_v51  ;;  %v156_v57 = vld [vmem:[#allocation5 + $0x228] sm:$0xff]  ;;  %v174_v59 = vld [vmem:[#allocation5 + $0x2b8] sm:$0xff]  ;;  %v157_v0 = vld [vmem:[#allocation5 + $0x230] sm:$0xff] }
  0x66   :  { %943 = vmatprep.subr.bf16.mxu0 %v942_v26  ;;  %v86_v61 = vld [vmem:[#allocation2 + $0x30] sm:$0xff]  ;;  %v988_v62 = vpack.c.bf16 %v156_v57, %v155_v56  ;;  %v990_v63 = vpack.c.bf16 %v174_v59, %v173_v58  ;;  %v175_v2 = vld [vmem:[#allocation5 + $0x2c0] sm:$0xff]  ;;  %v176_v3 = vld [vmem:[#allocation5 + $0x2c8] sm:$0xff] }
  0x67   :  { %973 = vmatpush3.bf16.msra.mxu1 %v972_v25  ;;  %v158_v1 = vld [vmem:[#allocation5 + $0x238] sm:$0xff]  ;;  %v994_v5 = vpack.c.bf16 %v176_v3, %v175_v2  ;;  %v159_v6 = vld [vmem:[#allocation5 + $0x240] sm:$0xff]  ;;  %v160_v7 = vld [vmem:[#allocation5 + $0x248] sm:$0xff] }
  0x68   :  { %975 = vmatprep.subr.bf16.mxu1 %v974_v30  ;;  %v992_v4 = vpack.c.bf16 %v158_v1, %v157_v0  ;;  %v177_v8 = vld [vmem:[#allocation5 + $0x2d0] sm:$0xff]  ;;  %v178_v9 = vld [vmem:[#allocation5 + $0x2d8] sm:$0xff]  ;;  %v996_v10 = vpack.c.bf16 %v160_v7, %v159_v6  ;;  %v179_v14 = vld [vmem:[#allocation5 + $0x2e0] sm:$0xff] }
  0x69   :  { %945 = vmatpush3.bf16.msra.mxu0 %v944_v34  ;;  %v998_v11 = vpack.c.bf16 %v178_v9, %v177_v8  ;;  %v161_v12 = vld [vmem:[#allocation5 + $0x250] sm:$0xff]  ;;  %v162_v13 = vld [vmem:[#allocation5 + $0x258] sm:$0xff]  ;;  %v180_v15 = vld [vmem:[#allocation5 + $0x2e8] sm:$0xff] }
  0x6a   :  { %979 = vmatprep.subr.bf16.mxu0 %v978_v36  ;;  %v1000_v16 = vpack.c.bf16 %v162_v13, %v161_v12  ;;  %v1002_v17 = vpack.c.bf16 %v180_v15, %v179_v14  ;;  %v163_v18 = vld [vmem:[#allocation5 + $0x260] sm:$0xff]  ;;  %v164_v19 = vld [vmem:[#allocation5 + $0x268] sm:$0xff]  ;;  %v181_v20 = vld [vmem:[#allocation5 + $0x2f0] sm:$0xff] }
  0x6b   :  { %977 = vmatpush3.bf16.msra.mxu1 %v976_v35  ;;  %v182_v21 = vld [vmem:[#allocation5 + $0x2f8] sm:$0xff]  ;;  %v1004_v22 = vpack.c.bf16 %v164_v19, %v163_v18  ;;  %v165_v24 = vld [vmem:[#allocation5 + $0x270] sm:$0xff]  ;;  %v84_v27 = vld [vmem:[#allocation2 + $0x20] sm:$0xff] }
  0x6c   :  { %1010 = vmatprep.subr.bf16.mxu1 %v1199_v50  ;;  %261 = vmatmul.mubr.f32.vlgmr.msra.gmra.mrb[0].mxu0 %v80_v41  ;;  %v1006_v23 = vpack.c.bf16 %v182_v21, %v181_v20  ;;  %v166_v25 = vld [vmem:[#allocation5 + $0x278] sm:$0xff]  ;;  %v477_v28 = vld [vmem:[#allocation7] sm:$0xff]  ;;  %v479_v30 = vld [vmem:[#allocation7 + $0x10] sm:$0xff] }
  0x6d   :  { %981 = vmatpush3.bf16.msra.mxu0 %v980_v42  ;;  %400 = vmatprep.mubr.f32.mxu0 %v85_v49  ;;  %v1008_v26 = vpack.c.bf16 %v166_v25, %v165_v24  ;;  %v478_v29 = vld [vmem:[#allocation7 + $0x8] sm:$0xff]  ;;  %v480_v32 = vld [vmem:[#allocation7 + $0x18] sm:$0xff]  ;;  %v481_v34 = vld [vmem:[#allocation7 + $0x20] sm:$0xff] }
  0x6e   :  { %331 = vmatmul.mubr.f32.vlgmr.msra.gmra.mrb[0].mxu1 %v82_v43  ;;  %983 = vmatprep.subr.bf16.mxu0 %v982_v45  ;;  %v1014_v31 = vpack.c.bf16 %v478_v29, %v477_v28  ;;  %v1017_v33 = vpack.c.bf16 %v480_v32, %v479_v30  ;;  %v482_v35 = vld [vmem:[#allocation7 + $0x28] sm:$0xff]  ;;  %v483_v37 = vld [vmem:[#allocation7 + $0x30] sm:$0xff]  ;;  %v484_v38 = vld [vmem:[#allocation7 + $0x38] sm:$0xff] }
  0x6f   :  { %1012 = vmatpush3.bf16.msra.mxu1 %v1011_v53  ;;  %841 = vmatprep.mubr.msk.f32.mxu1 %vm1200_vm0, %v1201_v60  ;;  %v1020_v36 = vpack.c.bf16 %v482_v35, %v481_v34  ;;  %v1023_v39 = vpack.c.bf16 %v484_v38, %v483_v37  ;;  %v485_v40 = vld [vmem:[#allocation7 + $0x40] sm:$0xff]  ;;  %v486_v41 = vld [vmem:[#allocation7 + $0x48] sm:$0xff]  ;;  %v487_v43 = vld [vmem:[#allocation7 + $0x50] sm:$0xff] }
  0x70   :  { %1013 = vmatprep.subr.bf16.mxu1 %v1199_v50  ;;  %v1026_v42 = vpack.c.bf16 %v486_v41, %v485_v40  ;;  %v488_v44 = vld [vmem:[#allocation7 + $0x58] sm:$0xff]  ;;  %v489_v46 = vld [vmem:[#allocation7 + $0x60] sm:$0xff]  ;;  %v490_v47 = vld [vmem:[#allocation7 + $0x68] sm:$0xff] }
  0x71   :  { %985 = vmatpush3.bf16.msra.mxu0 %v984_v54  ;;  %v1029_v45 = vpack.c.bf16 %v488_v44, %v487_v43  ;;  %v1032_v48 = vpack.c.bf16 %v490_v47, %v489_v46  ;;  %v491_v49 = vld [vmem:[#allocation7 + $0x70] sm:$0xff]  ;;  %v492_v51 = vld [vmem:[#allocation7 + $0x78] sm:$0xff]  ;;  %v571_v53 = vld [vmem:[#allocation8] sm:$0xff] }
  0x72   :  { %987 = vmatprep.subr.bf16.mxu0 %v986_v55  ;;  %842 = vmatmul.mubr.msk.f32.vlgmr.msra.gmra.mrb[2].mxu1 %vm192_vm1, %v86_v61  ;;  %v1035_v52 = vpack.c.bf16 %v492_v51, %v491_v49  ;;  %v572_v54 = vld [vmem:[#allocation8 + $0x8] sm:$0xff]  ;;  %v573_v55 = vld [vmem:[#allocation8 + $0x10] sm:$0xff]  ;;  %v574_v57 = vld [vmem:[#allocation8 + $0x18] sm:$0xff] }
  0x73   :  { %876 = vmatprep.mubr.msk.f32.mxu1 %vm1200_vm0, %v1201_v60  ;;  %1015 = vmatpush3.bf16.msra.mxu1 %v1014_v31  ;;  %v1038_v56 = vpack.c.bf16 %v572_v54, %v571_v53  ;;  %v1041_v58 = vpack.c.bf16 %v574_v57, %v573_v55  ;;  %v575_v59 = vld [vmem:[#allocation8 + $0x20] sm:$0xff]  ;;  %v580_v2 = vld [vmem:[#allocation8 + $0x48] sm:$0xff]  ;;  %v693_v29 = vld [vmem:[%s1345_s4] ss:$0 sm:$0xff]  ;;  %s1202_s4 = smov [#allocation10]  }
  0x74   :  { %1016 = vmatprep.subr.bf16.mxu1 %v1199_v50  ;;  %v579_v1 = vld [vmem:[#allocation8 + $0x40] sm:$0xff]  ;;  %v584_v8 = vld [vmem:[#allocation8 + $0x68] sm:$0xff]  ;;  %v694_v34 = vld [vmem:[%s1347_s6] ss:$0 sm:$0xff]  ;;  %s680_s28 = sshll.u32 %s1202_s4, 4  ;;  %s681_s28 = int_to_ptr.vmem [resolvable:$true] %s680_s28 }
  0x75   :  { %989 = vmatpush3.bf16.msra.mxu0 %v988_v62  ;;  %v577_v62 = vld [vmem:[#allocation8 + $0x30] sm:$0xff]  ;;  %v1050_v3 = vpack.c.bf16 %v580_v2, %v579_v1  ;;  %v583_v7 = vld [vmem:[#allocation8 + $0x60] sm:$0xff]  ;;  %s1163_s29 = scalar_lea.vmem %s681_s28, 128  ;;  %p1168_p5 = scmp.lt.s32.totalorder %s681_s28, %s681_s28 }
  0x76   :  { %991 = vmatprep.subr.bf16.mxu0 %v990_v63  ;;  %v578_v63 = vld [vmem:[#allocation8 + $0x38] sm:$0xff]  ;;  %v1056_v9 = vpack.c.bf16 %v584_v8, %v583_v7  ;;  %p1164_p4 = scmp.ne.s32.totalorder %s681_s28, %s1163_s29  ;;  %p1169_p6 = scmp.lt.s32.totalorder %s1163_s29, %s1163_s29 }
  0x77   :  { %1018 = vmatpush3.bf16.msra.mxu1 %v1017_v33  ;;  %v1047_v0 = vpack.c.bf16 %v578_v63, %v577_v62 }
  0x78   :  { %1019 = vmatprep.subr.bf16.mxu1 %v1199_v50  ;;  %p1170_p7 = por %p1169_p6, %p1168_p5 }
  0x79   :  { %993 = vmatpush3.bf16.msra.mxu0 %v992_v4  ;;  %v581_v4 = vld [vmem:[#allocation8 + $0x50] sm:$0xff] }
  0x7a   :  { %995 = vmatprep.subr.bf16.mxu0 %v994_v5  ;;  %v582_v5 = vld [vmem:[#allocation8 + $0x58] sm:$0xff]  ;;  %p1171_p8 = pnand %p1170_p7, %p1164_p4 }
  0x7b   :  { %1021 = vmatpush3.bf16.msra.mxu1 %v1020_v36  ;;  %v1053_v6 = vpack.c.bf16 %v582_v5, %v581_v4 }
  0x7c   :  { %1022 = vmatprep.subr.bf16.mxu1 %v1199_v50 }
  0x7d   :  { %997 = vmatpush3.bf16.msra.mxu0 %v996_v10 }
  0x7e   :  { %999 = vmatprep.subr.bf16.mxu0 %v998_v11  ;;  %v691_v11 = vld [vmem:[%s1343_s2] ss:$0 sm:$0xff] }
  0x7f   :  { %1024 = vmatpush3.bf16.msra.mxu1 %v1023_v39 }
  0x80   :  { %1025 = vmatprep.subr.bf16.mxu1 %v1199_v50 }
  0x81   :  { %1001 = vmatpush3.bf16.msra.mxu0 %v1000_v16 }
  0x82   :  { %1003 = vmatprep.subr.bf16.mxu0 %v1002_v17 }
  0x83   :  { %1027 = vmatpush3.bf16.msra.mxu1 %v1026_v42 }
  0x84   :  { %1028 = vmatprep.subr.bf16.mxu1 %v1199_v50 }
  0x85   :  { %1005 = vmatpush3.bf16.msra.mxu0 %v1004_v22 }
  0x86   :  { %1007 = vmatprep.subr.bf16.mxu0 %v1006_v23 }
  0x87   :  { %1030 = vmatpush3.bf16.msra.mxu1 %v1029_v45 }
  0x88   :  { %1031 = vmatprep.subr.bf16.mxu1 %v1199_v50 }
  0x89   :  { %1009 = vmatpush3.bf16.msra.mxu0 %v1008_v26  ;;  %v585_v26 = vld [vmem:[#allocation8 + $0x70] sm:$0xff] }
  0x8a   :  { %1037 = vmatprep.subr.bf16.mxu0 %v1199_v50 }
  0x8b   :  { %1033 = vmatpush3.bf16.msra.mxu1 %v1032_v48 }
  0x8c   :  { %401 = vmatmul.mubr.f32.vlgmr.msra.gmra.mrb[2].mxu0 %v84_v27  ;;  %1034 = vmatprep.subr.bf16.mxu1 %v1199_v50  ;;  %v586_v27 = vld [vmem:[#allocation8 + $0x78] sm:$0xff] }
  0x8d   :  { %911 = vmatprep.mubr.msk.f32.mxu0 %vm1200_vm0, %v1201_v60  ;;  %1039 = vmatpush3.bf16.msra.mxu0 %v1038_v56  ;;  %v576_v60 = vld [vmem:[#allocation8 + $0x28] sm:$0xff]  ;;  %v1059_v28 = vpack.c.bf16 %v586_v27, %v585_v26 }
  0x8e   :  { %1040 = vmatprep.subr.bf16.mxu0 %v1199_v50  ;;  %v1044_v61 = vpack.c.bf16 %v576_v60, %v575_v59 }
  0x8f   :  { %1036 = vmatpush3.bf16.msra.mxu1 %v1035_v52 }
  0x91   :  { %1042 = vmatpush3.bf16.msra.mxu0 %v1041_v58 }
  0x92   :  { %1043 = vmatprep.subr.bf16.mxu0 %v1199_v50 }
  0x95   :  { %1045 = vmatpush3.bf16.msra.mxu0 %v1044_v61 }
  0x96   :  { %1046 = vmatprep.subr.bf16.mxu0 %v1199_v50 }
  0x99   :  { %1048 = vmatpush3.bf16.msra.mxu0 %v1047_v0 }
  0x9a   :  { %1049 = vmatprep.subr.bf16.mxu0 %v1199_v50 }
  0x9d   :  { %1051 = vmatpush3.bf16.msra.mxu0 %v1050_v3 }
  0x9e   :  { %1052 = vmatprep.subr.bf16.mxu0 %v1199_v50 }
  0xa1   :  { %1054 = vmatpush3.bf16.msra.mxu0 %v1053_v6 }
  0xa2   :  { %1055 = vmatprep.subr.bf16.mxu0 %v1199_v50 }
  0xa5   :  { %1057 = vmatpush3.bf16.msra.mxu0 %v1056_v9 }
  0xa6   :  { %1058 = vmatprep.subr.bf16.mxu0 %v1199_v50 }
  0xa9   :  { %1060 = vmatpush3.bf16.msra.mxu0 %v1059_v28 }
 0x13f   :  { %v727_v10 = vpop.f32.mrb[0].mxu0 }
 0x140   :  { %v728_v12 = vpop.f32.mrb[1].mxu0 }
 0x141   :  { %v762_v13 = vpop.f32.mrb[0].mxu1  ;;  %v729_v14 = vadd.f32 %v728_v12, %v727_v10 }
 0x142   :  { %v763_v15 = vpop.f32.mrb[1].mxu1 }
 0x143   :  { %v764_v16 = vadd.f32 %v763_v15, %v762_v13  ;;  %v263_v17 = vadd.f32 %v729_v14, %v691_v11 }
 0x145   :  { %v333_v18 = vadd.f32 %v764_v16, %v263_v17  ;;  %v472_v19 = vpop.f32.mrb[2].mxu1 }
 0x146   :  { %v843_v20 = vpop.f32.mrb[3].mxu1 }
 0x15f   :  { %v797_v21 = vpop.f32.mrb[2].mxu0 }
 0x160   :  { %v798_v22 = vpop.f32.mrb[3].mxu0 }
 0x161   :  { %v799_v23 = vadd.f32 %v798_v22, %v797_v21 }
 0x163   :  { %v403_v24 = vadd.f32 %v799_v23, %v333_v18 }
 0x165   :  { %v473_v25 = vadd.f32 %v472_v19, %v403_v24 }
 0x167   :  { %v476_v50 = vmax.f32 %v473_v25, 0.0 }
 0x169   :  { %877 = vmatmul.mubr.f32.vlgmr.msra.gmra.mrb[4].mxu1 %v476_v50 }
 0x23c   :  { %v566_v30 = vpop.f32.mrb[4].mxu1 }
 0x23d   :  { %v567_v31 = vadd.f32 %v693_v29, %v566_v30  ;;  %v878_v32 = vpop.f32.mrb[5].mxu1 }
 0x23f   :  { %v570_v33 = vmax.f32 %v567_v31, 0.0 }
 0x241   :  { %912 = vmatmul.mubr.f32.vlgmr.msra.gmra.mrb[4].mxu0 %v570_v33 }
 0x314   :  { %v660_v35 = vpop.f32.mrb[4].mxu0 }
 0x315   :  { %v661_v36 = vadd.f32 %v694_v34, %v660_v35  ;;  %v913_v37 = vpop.f32.mrb[5].mxu0 }
 0x317   :  { %664 = vmax.xlane.f32.xlu0 %v661_v36 }
 0x3a4   :  { %v665_v38 = vpop.xlane.xlu0 %664 }
 0x3a5   :  { %v666_v39 = vsub.f32 %v661_v36, %v665_v38 }
 0x3a7   :  { %v667_v40 = vmul.f32 1.442695, %v666_v39 }
 0x3a9   :  { %1071 = vpow2.f32 %v667_v40 }
 0x3b3   :  { %v1072_v41 = vpop.eup %1071 }
 0x3b4   :  { %669 = vadd.xlane.f32.xlu0 %v1072_v41 }
 0x441   :  { %v670_v42 = vpop.xlane.xlu0 %669 }
 0x442   :  { %1073 = vrcp.f32 %v670_v42 }
 0x44c   :  { %v1074_v43 = vpop.eup %1073 }
 0x44d   :  { %v672_v44 = vmul.f32 %v1074_v43, %v1072_v41 }
 0x44f   :  { %673 = vst [vmem:[#allocation10] sm:$0xff] %v672_v44 }
 0x450   :  { %1174 = shalt.err (!%p1171_p8)
}
 0x451   :  { %s1175_s8 = scalar_lea.hbm %s1348_s7, 128 }
 0x452   :  { %p1176_p9 = scmp.ne.s32.totalorder %s1348_s7, %s1175_s8  ;;  %p1179_p10 = scmp.lt.u32.totalorder %s1175_s8, %s1348_s7 }
 0x454   :  { %p1181_p11 = pnand %p1179_p10, %p1176_p9 }
 0x456   :  { %1184 = shalt.err (!%p1181_p11)
}
 0x457   :  { %683 = dma.vmem_to_hbm [thread:$0]  %s681_s28, 128, %s1348_s7, [#allocation4]  }
 0x458   :  { %1191 = dma.done.wait [#allocation4], 128  }
 0x459   :  { %1192 = vsyncadd [#allocation4], 4294967168 }
 0x45a   :  { %687 = vsyncpa [#allocation3], 1 }
 0x45b   :  { %688 = vsyncpa [#allocation6], 1 }
 0x45c   :  { %689 = vsyncpa [#allocation9], 1 }
 0x45d   :  { %690 = vsyncpa [#allocation4], 1 }

</bundles_post_ra>
